<compile_context>
chip_gen: v6e
topology: v6e:2x2x1
jax: 0.10.0
libtpu: 0.0.40
codegen_flags: <defaults>
</compile_context>

<pallas_src>
import functools

import jax
import jax.numpy as jnp
from jax.experimental import pallas as pl
from jax.experimental.pallas import tpu as pltpu


def _round_up(x: int, m: int) -> int:
    return ((x + m - 1) // m) * m


def net_kernel(x_ref, w1_ref, b1_ref, w2_ref, b2_ref, o_ref):
    # Hidden linear layer (MXU matmul, f32 accumulation).
    h = jnp.dot(x_ref[...], w1_ref[...], preferred_element_type=jnp.float32)
    h = h + b1_ref[...]                       # (1, H) bias broadcasts over rows

    # Softmax along the feature axis (F.softmax default dim=1 for 2-D input).
    h = h - jnp.max(h, axis=-1, keepdims=True)
    e = jnp.exp(h)
    p = e / jnp.sum(e, axis=-1, keepdims=True)    # exact divide -> f32 parity

    # Output linear layer.
    out = jnp.dot(p.astype(w2_ref.dtype), w2_ref[...],
                  preferred_element_type=jnp.float32)
    o_ref[...] = (out + b2_ref[...]).astype(o_ref.dtype)


@functools.partial(jax.jit, static_argnames=("block_batch", "compute_dtype"))
def net_forward(x, w1, b1, w2, b2, *, block_batch=1024, compute_dtype=jnp.float32):
    """Fused forward of Net.

    x:  (B, n_feature) float32
    w1: (n_feature, n_hidden)   (pre-transposed vs. PyTorch's (out, in))
    b1: (1, n_hidden)
    w2: (n_hidden, n_output)
    b2: (1, n_output)
    """
    B, F = x.shape
    H = w1.shape[1]
    O = w2.shape[1]

    comp_isz = jnp.dtype(compute_dtype).itemsize
    out_isz = x.dtype.itemsize

    # ---- batch tiling -------------------------------------------------------
    # No lane padding: minor dims of every block equal the full array dims.
    if B <= 8:
        TB = B                                     # block == full batch dim
    else:
        TB = min(block_batch, _round_up(B, 8))
        # v7x megacore: ensure >= 2 blocks so the "parallel" axis shards
        # across both TensorCores (no-op change on 1-TC v5e/v6e).
        TB = min(TB, _round_up((B + 1) // 2, 8))

    # ---- explicit VMEM budget ----------------------------------------------
    # VMEM tiles are physically lane-padded to 128, so budget with padded dims.
    Fl, Hl, Ol = (_round_up(d, 128) for d in (F, H, O))

    def vmem_est(tb):
        streamed = 2 * tb * Fl * comp_isz + 2 * tb * Ol * out_isz   # x, out (double-buffered)
        weights = 2 * (Fl * Hl * comp_isz + Hl * 4                  # w1, b1 (double-buffered)
                       + Hl * Ol * comp_isz + Ol * 4)               # w2, b2
        interm = 4 * tb * Hl * 4                                    # h / e / p + headroom (f32)
        return streamed + weights + interm

    VMEM_BUDGET = 24 * 1024 * 1024          # safe on v7x (64 MiB phys / 32 MiB scoped default)
    while TB > 8 and vmem_est(TB) > VMEM_BUDGET:
        TB = max(8, _round_up(TB // 2, 8))

    grid = (pl.cdiv(B, TB),)
    # NOTE: if B is not a multiple of TB, the final partial block reads
    # unspecified rows; rows are independent and their writes are masked off,
    # so results are correct (may show NaN only under NaN-trapping debug modes).

    vmem_limit = int(min(max(2 * vmem_est(TB), 16 * 1024 * 1024), 48 * 1024 * 1024))

    # ---- optional bf16 matmul operands (no-op casts for the f32 default) ----
    x_c = x.astype(compute_dtype)
    w1_c = w1.astype(compute_dtype)
    w2_c = w2.astype(compute_dtype)

    cost = pl.CostEstimate(
        flops=2 * B * (F * H + H * O),
        transcendentals=B * H,
        bytes_accessed=(B * F * comp_isz + F * H * comp_isz + H * O * comp_isz
                        + (H + O) * 4 + B * O * out_isz),
    )

    return pl.pallas_call(
        net_kernel,
        out_shape=jax.ShapeDtypeStruct((B, O), x.dtype),
        grid=grid,
        in_specs=[
            pl.BlockSpec((TB, F), lambda i: (i, 0)),   # x: batch-tiled, minor dim = full F
            pl.BlockSpec((F, H), lambda i: (0, 0)),    # w1: VMEM-resident
            pl.BlockSpec((1, H), lambda i: (0, 0)),    # b1: VMEM-resident
            pl.BlockSpec((H, O), lambda i: (0, 0)),    # w2: VMEM-resident
            pl.BlockSpec((1, O), lambda i: (0, 0)),    # b2: VMEM-resident
        ],
        out_specs=pl.BlockSpec((TB, O), lambda i: (i, 0)),
        compiler_params=pltpu.CompilerParams(
            dimension_semantics=("parallel",),
            vmem_limit_bytes=vmem_limit,
        ),
        cost_estimate=cost,
    )(x_c, w1_c, b1, w2_c, b2)


def init_linear_params(key, in_features, out_features):
    # Deterministic init mimicking torch.nn.Linear: U(-1/sqrt(in), 1/sqrt(in)).
    # Pad-free and done once at init time (never inside the jitted forward).
    kw, kb = jax.random.split(key)
    bound = 1.0 / jnp.sqrt(jnp.float32(in_features))
    # Stored as (in, out) so the kernel can do x @ W directly.
    w = jax.random.uniform(kw, (in_features, out_features), jnp.float32, -bound, bound)
    b = jax.random.uniform(kb, (1, out_features), jnp.float32, -bound, bound)
    return w, b


def reference_forward(x, w1, b1, w2, b2):
    h = jax.nn.softmax(x @ w1 + b1, axis=-1)
    return h @ w2 + b2


if __name__ == "__main__":
    n_feature, n_hidden, n_output = 16, 32, 4

    key = jax.random.PRNGKey(0)
    kx, k1, k2, kx2 = jax.random.split(key, 4)

    w1, b1 = init_linear_params(k1, n_feature, n_hidden)
    w2, b2 = init_linear_params(k2, n_hidden, n_output)

    # Case 1: small batch (single grid step).
    batch = 8
    x = jax.random.normal(kx, (batch, n_feature), jnp.float32)
    out = jax.block_until_ready(net_forward(x, w1, b1, w2, b2))
    ref = reference_forward(x, w1, b1, w2, b2)
    assert out.shape == (batch, n_output)
    assert jnp.allclose(out, ref, atol=1e-3, rtol=1e-3), (
        f"case1 max abs err {jnp.max(jnp.abs(out - ref))}")

    # Case 2: larger batch -> 2 batch-tiled grid steps (exercises the grid and
    # the v7x two-TensorCore split path).
    batch2 = 16
    x2 = jax.random.normal(kx2, (batch2, n_feature), jnp.float32)
    out2 = jax.block_until_ready(net_forward(x2, w1, b1, w2, b2))
    ref2 = reference_forward(x2, w1, b1, w2, b2)
    assert out2.shape == (batch2, n_output)
    assert jnp.allclose(out2, ref2, atol=1e-3, rtol=1e-3), (
        f"case2 max abs err {jnp.max(jnp.abs(out2 - ref2))}")

    print("KERNEL_OK")
</pallas_src>

<mosaic_0001>
module attributes {stable_mosaic.version = 11 : i64} {
  func.func @net_kernel(%arg0: i32, %arg1: memref<8x16xf32, #tpu.memory_space<vmem>>, %arg2: memref<16x32xf32, #tpu.memory_space<vmem>>, %arg3: memref<1x32xf32, #tpu.memory_space<vmem>>, %arg4: memref<32x4xf32, #tpu.memory_space<vmem>>, %arg5: memref<1x4xf32, #tpu.memory_space<vmem>>, %arg6: memref<8x4xf32, #tpu.memory_space<vmem>>) attributes {dimension_semantics = [#tpu.dimension_semantics<parallel>], iteration_bounds = array<i64: 1>, scalar_prefetch = 0 : i64, scratch_operands = 0 : i64, tpu.core_type = #tpu.core_type<tc>, window_params = [{transform_indices = @transform_0, window_bounds = array<i64: 8, 16>}, {pipeline_mode = #tpu.pipeline_mode<synchronous>, transform_indices = @transform_1, window_bounds = array<i64: 16, 32>}, {pipeline_mode = #tpu.pipeline_mode<synchronous>, transform_indices = @transform_2, window_bounds = array<i64: 1, 32>}, {pipeline_mode = #tpu.pipeline_mode<synchronous>, transform_indices = @transform_3, window_bounds = array<i64: 32, 4>}, {pipeline_mode = #tpu.pipeline_mode<synchronous>, transform_indices = @transform_4, window_bounds = array<i64: 1, 4>}, {transform_indices = @transform_5, window_bounds = array<i64: 8, 4>}]} {
    %c0 = arith.constant 0 : index
    %c0_0 = arith.constant 0 : index
    %0 = vector.load %arg1[%c0, %c0_0] : memref<8x16xf32, #tpu.memory_space<vmem>>, vector<8x16xf32>
    %c0_1 = arith.constant 0 : index
    %c0_2 = arith.constant 0 : index
    %1 = vector.load %arg2[%c0_1, %c0_2] : memref<16x32xf32, #tpu.memory_space<vmem>>, vector<16x32xf32>
    %cst = arith.constant dense<0.000000e+00> : vector<8x32xf32>
    %2 = tpu.matmul %0, %1, %cst {dimension_numbers = #tpu.dot_dimension_numbers<[1], [0], [0], [1], [0, 0, 1, 1], [], []>} : vector<8x16xf32>, vector<16x32xf32>, vector<8x32xf32> -> vector<8x32xf32>
    %c0_3 = arith.constant 0 : index
    %c0_4 = arith.constant 0 : index
    %3 = vector.load %arg3[%c0_3, %c0_4] : memref<1x32xf32, #tpu.memory_space<vmem>>, vector<1x32xf32>
    %4 = vector.broadcast %3 : vector<1x32xf32> to vector<8x32xf32>
    %5 = arith.addf %2, %4 : vector<8x32xf32>
    %cst_5 = arith.constant dense<0xFF800000> : vector<8xf32>
    %6 = vector.multi_reduction <maximumf>, %5, %cst_5 [1] : vector<8x32xf32> to vector<8xf32>
    %7 = vector.shape_cast %6 : vector<8xf32> to vector<8x1xf32>
    %8 = vector.broadcast %7 : vector<8x1xf32> to vector<8x32xf32>
    %9 = arith.subf %5, %8 : vector<8x32xf32>
    %10 = math.exp %9 : vector<8x32xf32>
    %cst_6 = arith.constant dense<0.000000e+00> : vector<8xf32>
    %11 = vector.multi_reduction <add>, %10, %cst_6 [1] : vector<8x32xf32> to vector<8xf32>
    %12 = vector.shape_cast %11 : vector<8xf32> to vector<8x1xf32>
    %13 = vector.broadcast %12 : vector<8x1xf32> to vector<8x32xf32>
    %14 = arith.divf %10, %13 : vector<8x32xf32>
    %c0_7 = arith.constant 0 : index
    %c0_8 = arith.constant 0 : index
    %15 = vector.load %arg4[%c0_7, %c0_8] : memref<32x4xf32, #tpu.memory_space<vmem>>, vector<32x4xf32>
    %cst_9 = arith.constant dense<0.000000e+00> : vector<8x4xf32>
    %16 = tpu.matmul %14, %15, %cst_9 {dimension_numbers = #tpu.dot_dimension_numbers<[1], [0], [0], [1], [0, 0, 1, 1], [], []>} : vector<8x32xf32>, vector<32x4xf32>, vector<8x4xf32> -> vector<8x4xf32>
    %c0_10 = arith.constant 0 : index
    %c0_11 = arith.constant 0 : index
    %17 = vector.load %arg5[%c0_10, %c0_11] : memref<1x4xf32, #tpu.memory_space<vmem>>, vector<1x4xf32>
    %18 = vector.broadcast %17 : vector<1x4xf32> to vector<8x4xf32>
    %19 = arith.addf %16, %18 : vector<8x4xf32>
    %c0_12 = arith.constant 0 : index
    %c0_13 = arith.constant 0 : index
    %20 = vector.load %arg6[%c0_12, %c0_13] : memref<8x4xf32, #tpu.memory_space<vmem>>, vector<8x4xf32>
    tpu.vector_store %arg6[%c0_12, %c0_13], %19 {strides = array<i32>} : memref<8x4xf32, #tpu.memory_space<vmem>>, vector<8x4xf32>,
    return
  }
  func.func @transform_0(%arg0: i32) -> (i32, i32) {
    %c0_i32 = arith.constant 0 : i32
    %c0_i32_0 = arith.constant 0 : i32
    return %arg0, %c0_i32 : i32, i32
  }
  func.func @transform_1(%arg0: i32) -> (i32, i32) {
    %c0_i32 = arith.constant 0 : i32
    %c0_i32_0 = arith.constant 0 : i32
    %c0_i32_1 = arith.constant 0 : i32
    return %c0_i32, %c0_i32_0 : i32, i32
  }
  func.func @transform_2(%arg0: i32) -> (i32, i32) {
    %c0_i32 = arith.constant 0 : i32
    %c0_i32_0 = arith.constant 0 : i32
    %c0_i32_1 = arith.constant 0 : i32
    return %c0_i32, %c0_i32_0 : i32, i32
  }
  func.func @transform_3(%arg0: i32) -> (i32, i32) {
    %c0_i32 = arith.constant 0 : i32
    %c0_i32_0 = arith.constant 0 : i32
    %c0_i32_1 = arith.constant 0 : i32
    return %c0_i32, %c0_i32_0 : i32, i32
  }
  func.func @transform_4(%arg0: i32) -> (i32, i32) {
    %c0_i32 = arith.constant 0 : i32
    %c0_i32_0 = arith.constant 0 : i32
    %c0_i32_1 = arith.constant 0 : i32
    return %c0_i32, %c0_i32_0 : i32, i32
  }
  func.func @transform_5(%arg0: i32) -> (i32, i32) {
    %c0_i32 = arith.constant 0 : i32
    %c0_i32_0 = arith.constant 0 : i32
    return %arg0, %c0_i32 : i32, i32
  }
}

</mosaic_0001>

<bundles_post_ra>
// kernel: net_forward.1
= control target key start
LH: loop header
LB: loop body
LE: loop exit
PB: predicated region body
PF: predicated region fallthrough
CT: control target
= control target key end

     0   :  { %v242_v0 = vmov 0.0   ;;  %vm243_vm0 = vmmov 0   ;;  %vm30_vm1 = vcmask 130048   ;;  %vm104_vm2 = vcmask 261120   ;;  %s307_s1 = inlined_call_operand.vmem [shape: f32[16,32], index: 1, kind: input, shape index: {}]   ;;  %s308_s0 = inlined_call_operand.vmem [shape: f32[8,16], index: 0, kind: input, shape index: {}]   ;;  %s309_s2 = inlined_call_operand.vmem [shape: f32[1,32], index: 2, kind: input, shape index: {}]   ;;  %s310_s3 = inlined_call_operand.vmem [shape: f32[32,4], index: 3, kind: input, shape index: {}]   ;;  %s311_s4 = inlined_call_operand.vmem [shape: f32[1,4], index: 4, kind: input, shape index: {}]   ;;  %s312_s5 = inlined_call_operand.vmem [shape: f32[8,4], index: 5, kind: output, shape index: {}]  }
   0x1   :  { %218 = vmatprep.subr.mxu0 %v242_v0  ;;  %v22_v1 = vld [vmem:[%s307_s1 + $0x8] sm:$0xff]  ;;  %v21_v2 = vld [vmem:[%s307_s1] sm:$0xff]  ;;  %222 = vmatprep.mubr.msk.f32.mxu0 %vm243_vm0, %v242_v0  ;;  %v119_v14 = vld [vmem:[%s310_s3 + $0x18] sm:$0xff]  ;;  %vm200_vm3 = vcmask 31744  }
   0x2   :  { %219 = vmatpush3.msra.mxu0 %v22_v1  ;;  %v20_v3 = vld [vmem:[%s308_s0] sm:$0xff]  ;;  %225 = vmatprep.subr.mxu1 %v242_v0  ;;  %v118_v15 = vld [vmem:[%s310_s3 + $0x10] sm:$0xff]  ;;  %v117_v16 = vld [vmem:[%s310_s3 + $0x8] sm:$0xff] }
   0x3   :  { %220 = vmatprep.subr.mxu0 %v242_v0  ;;  %233 = vmatprep.mubr.msk.f32.mxu1 %vm243_vm0, %v242_v0  ;;  %v206_v4 = vld [vmem:[%s309_s2] ss:$0 sm:$0xff] }
   0x4   :  { %221 = vmatpush3.msra.mxu0 %v21_v2  ;;  %226 = vmatpush3.msra.mxu1 %v119_v14  ;;  %v116_v17 = vld [vmem:[%s310_s3] sm:$0xff] }
   0x5   :  { %223 = vmatmul.mubr.msk.f32.vlgmr.msra.gmra.mxu0 %vm30_vm1, %v20_v3  ;;  %227 = vmatprep.subr.mxu1 %v242_v0  ;;  %v208_v21 = vld [vmem:[%s311_s4] ss:$0 sm:$0xff] }
   0x6   :  { %228 = vmatpush3.msra.mxu1 %v118_v15 }
   0x7   :  { %229 = vmatprep.subr.mxu1 %v242_v0 }
   0x8   :  { %230 = vmatpush3.msra.mxu1 %v117_v16 }
   0x9   :  { %231 = vmatprep.subr.mxu1 %v242_v0 }
   0xa   :  { %232 = vmatpush3.msra.mxu1 %v116_v17 }
  0xc5   :  { %v100_v5 = vpop.f32.mrf.mxu0 }
  0xc6   :  { %v101_v6 = vadd.f32 %v206_v4, %v100_v5 }
  0xc7   :  { %v224_v7 = vpop.f32.mrf.mxu0 }
  0xc8   :  { %v105_v8 = vsel %vm104_vm2, %v101_v6, -inf }
  0xc9   :  { %106 = vmax.xlane.f32.xlu0 %v105_v8 }
 0x152   :  { %v107_v9 = vpop.xlane.xlu0 %106 }
 0x153   :  { %v108_v10 = vsub.f32 %v101_v6, %v107_v9 }
 0x155   :  { %v109_v11 = vmul.f32 1.442695, %v108_v10 }
 0x157   :  { %238 = vpow2.f32 %v109_v11 }
 0x164   :  { %v239_v12 = vpop.eup %238 }
 0x165   :  { %v111_v13 = vsel %vm104_vm2, %v239_v12, 0.0 }
 0x166   :  { %112 = vadd.xlane.f32.xlu0 %v111_v13 }
 0x1ef   :  { %v113_v18 = vpop.xlane.xlu0 %112 }
 0x1f0   :  { %240 = vrcp.f32 %v113_v18 }
 0x1fd   :  { %v241_v19 = vpop.eup %240 }
 0x1fe   :  { %v115_v20 = vmul.f32 %v241_v19, %v239_v12 }
 0x200   :  { %234 = vmatmul.mubr.msk.f32.vlgmr.msra.gmra.mxu1 %vm104_vm2, %v115_v20 }
 0x2c0   :  { %v196_v22 = vpop.f32.mrf.mxu1 }
 0x2c1   :  { %v197_v23 = vadd.f32 %v208_v21, %v196_v22 }
 0x2c2   :  { %v235_v24 = vpop.f32.mrf.mxu1 }
 0x2c3   :  { %201 = vst.msk [vmem:[%s312_s5] sm:$0xff] %vm200_vm3, %v197_v23 }

</bundles_post_ra>
